<compile_context>
chip_gen: v7x
topology: tpu7x:2x2x1
jax: 0.10.0
libtpu: 0.0.40
codegen_flags: <defaults>
</compile_context>

<pallas_src>
import functools

import jax
import jax.numpy as jnp
from jax.experimental import pallas as pl
from jax.experimental.pallas import tpu as pltpu


def _round_up(n, m):
    return ((n + m - 1) // m) * m


def _generator_nll_kernel(x_ref, w_ref, b_ref, t_ref, o_ref, tlp_ref,
                          m_sc, l_sc, g_sc):
    # x_ref: (tm, H) bf16   w_ref: (H, tv) bf16   b_ref: (1, tv) f32
    # t_ref: (tm, 1) i32    o_ref: (tm, V_pad) resident score block (bf16/f32)
    # tlp_ref: (tm, 1) f32 target log-prob
    # m_sc / l_sc / g_sc: (tm, 1) f32 running max / running sum-exp / target logit
    j = pl.program_id(1)
    nv = pl.num_programs(1)
    tv = w_ref.shape[1]

    @pl.when(j == 0)
    def _():
        m_sc[...] = jnp.full(m_sc.shape, -jnp.inf, dtype=m_sc.dtype)
        l_sc[...] = jnp.zeros(l_sc.shape, dtype=l_sc.dtype)
        g_sc[...] = jnp.zeros(g_sc.shape, dtype=g_sc.dtype)

    # bf16 x bf16 -> f32 MXU accumulation; bias added in f32.
    logits = jnp.dot(x_ref[...], w_ref[...],
                     preferred_element_type=jnp.float32) + b_ref[...]

    # Online logsumexp update over the vocab axis (all f32).
    m_old = m_sc[...]
    m_new = jnp.maximum(m_old, jnp.max(logits, axis=-1, keepdims=True))
    corr = jnp.exp(m_old - m_new)
    l_sc[...] = corr * l_sc[...] + jnp.sum(jnp.exp(logits - m_new),
                                           axis=-1, keepdims=True)
    m_sc[...] = m_new

    # Fused NLL gather: exactly one vocab tile contains each row's target column.
    # Compare iota == (t - j*tv): the (tm,1) subtract is ~tv x cheaper than a
    # (tm,tv) iota offset add.
    cols = jax.lax.broadcasted_iota(jnp.int32, logits.shape, 1)
    hit = cols == (t_ref[...] - j * tv)
    g_sc[...] += jnp.sum(jnp.where(hit, logits, 0.0), axis=-1, keepdims=True)

    # Stash raw logits into the resident output block; normalize at the last tile.
    off = pl.multiple_of(j * tv, tv)
    o_ref[:, pl.ds(off, tv)] = logits.astype(o_ref.dtype)

    @pl.when(j == nv - 1)
    def _():
        lse = m_sc[...] + jnp.log(l_sc[...])
        o_ref[...] = (o_ref[...] - lse).astype(o_ref.dtype)
        tlp_ref[...] = g_sc[...] - lse


@functools.partial(
    jax.jit,
    static_argnames=("padding_idx", "tm", "tv", "vmem_limit", "score_dtype"))
def _nmt_loss_compute_impl(tgt, output, w_hv, bias, *, padding_idx, tm, tv,
                           vmem_limit, score_dtype):
    B, T1 = tgt.shape
    T = T1 - 1
    _, To, H = output.shape
    assert To == T, "decoder output length must match tgt[:, 1:]"
    Hw, V = w_hv.shape
    assert Hw == H
    N = B * T

    target = tgt[:, 1:].reshape(N).astype(jnp.int32)

    n_pad = _round_up(N, tm)
    v_pad = _round_up(V, tv)
    out_bytes = 2 if score_dtype == jnp.bfloat16 else 4

    # bf16 MXU inputs; post-matmul math stays f32 inside the kernel.
    x2 = output.reshape(N, H).astype(jnp.bfloat16)
    t2 = target
    if n_pad != N:
        x2 = jnp.pad(x2, ((0, n_pad - N), (0, 0)))
        t2 = jnp.pad(t2, (0, n_pad - N), constant_values=padding_idx)
    t2 = t2.reshape(n_pad, 1)

    w2 = w_hv.astype(jnp.bfloat16)
    b2 = bias.reshape(1, V).astype(jnp.float32)
    if v_pad != V:
        # Padded vocab columns get a hugely negative *f32* bias -> never win the
        # max, exp underflows to exactly 0.  (Bias / logits stay f32; only the
        # final score store may be bf16, where -1e30 is still representable.)
        w2 = jnp.pad(w2, ((0, 0), (0, v_pad - V)))
        b2 = jnp.pad(b2, ((0, 0), (0, v_pad - V)), constant_values=-1e30)

    grid = (n_pad // tm, v_pad // tv)
    n_row_tiles = grid[0]

    cost = pl.CostEstimate(
        flops=2 * n_pad * H * v_pad,
        transcendentals=n_pad * v_pad,
        bytes_accessed=(n_row_tiles * H * v_pad * 2   # weight, re-streamed/row tile
                        + n_pad * H * 2               # activations (bf16)
                        + n_pad * v_pad * out_bytes   # score writeback
                        + n_row_tiles * v_pad * 4     # bias, re-streamed/row tile
                        + n_pad * 8),                 # targets + target log-probs
    )

    logprobs, tgt_lp = pl.pallas_call(
        _generator_nll_kernel,
        out_shape=(
            jax.ShapeDtypeStruct((n_pad, v_pad), score_dtype),
            jax.ShapeDtypeStruct((n_pad, 1), jnp.float32),
        ),
        grid_spec=pltpu.PrefetchScalarGridSpec(
            num_scalar_prefetch=0,
            grid=grid,
            in_specs=[
                pl.BlockSpec((tm, H), lambda i, j: (i, 0)),   # rows (resident over j)
                pl.BlockSpec((H, tv), lambda i, j: (0, j)),   # weight, streamed over V
                pl.BlockSpec((1, tv), lambda i, j: (0, j)),   # bias slice
                pl.BlockSpec((tm, 1), lambda i, j: (i, 0)),   # target ids per row
            ],
            out_specs=[
                pl.BlockSpec((tm, v_pad), lambda i, j: (i, 0)),  # scores (resident)
                pl.BlockSpec((tm, 1), lambda i, j: (i, 0)),      # target log-prob
            ],
            scratch_shapes=[
                pltpu.VMEM((tm, 1), jnp.float32),   # running max
                pltpu.VMEM((tm, 1), jnp.float32),   # running sum of exp
                pltpu.VMEM((tm, 1), jnp.float32),   # target logit accumulator
            ],
        ),
        compiler_params=pltpu.CompilerParams(
            dimension_semantics=("parallel", "arbitrary"),
            vmem_limit_bytes=vmem_limit,
        ),
        cost_estimate=cost,
    )(x2, w2, b2, t2)

    if n_pad != N or v_pad != V:
        # TODO(synk): for production shapes prefer tv | V and upstream row padding
        # (or returning a masked padded block); this slice materializes an N*V copy.
        scores = logprobs[:N, :V]
    else:
        scores = logprobs
    scores = scores.reshape(B, T, V)

    # NLLLoss(ignore_index=padding_idx, reduction='sum') / num_non_pad
    nonpad = target != padding_idx
    normalization = jnp.sum(nonpad).astype(jnp.float32)
    nll_sum = -jnp.sum(jnp.where(nonpad, tgt_lp[:N, 0], 0.0))
    # Matches the reference module exactly: a fully-padded batch yields nan
    # (sum-NLL / 0), same as PyTorch.
    loss = nll_sum / normalization
    return loss, scores


def nmt_loss_compute(tgt, output, w_hv, bias, *, padding_idx,
                     tm=None, tv=None, score_dtype=jnp.bfloat16):
    """NMTLossCompute.forward(tgt, output) with generator = Linear + LogSoftmax.

    tgt:    [B, T+1] int token ids;   output: [B, T, H] decoder states
    w_hv:   [H, V] generator weight, pre-transposed ONCE outside this call
    bias:   [V]
    Returns (loss, scores[B, T, V]); scores are bf16 by default (loss stays f32).
    """
    # TODO(synk): LabelSmoothingLoss (label_smoothing > 0) KL-div branch is not
    # implemented; this covers the default NLLLoss path of NMTLossCompute.
    B, T1 = tgt.shape
    N = B * (T1 - 1)
    H, V = w_hv.shape

    # Vocab tile: prefer a tv that divides V (no vocab padding, no post-kernel
    # slice copy); 512 keeps the 256-wide MXU columns fed on v6e/v7x.
    if tv is None:
        for cand in (512, 256, 128):
            if V % cand == 0:
                tv = cand
                break
        else:
            tv = 512
    tv = int(max(128, min(tv, _round_up(V, 128))))
    v_pad = _round_up(V, tv)

    out_bytes = 2 if score_dtype == jnp.bfloat16 else 4

    # Per-generation VMEM limit: physical - 16 MiB headroom, capped at 112 MiB
    # (-> 48 MiB on v7x's 64 MiB/TC, 112 MiB on v5e/v6e's 128 MiB).
    try:
        vmem_cap = int(getattr(pltpu.get_tpu_info(), "vmem_capacity_bytes",
                               64 * 1024 * 1024))
    except Exception:
        vmem_cap = 64 * 1024 * 1024
    vmem_limit = max(32 * 1024 * 1024,
                     min(vmem_cap - 16 * 1024 * 1024, 112 * 1024 * 1024))

    # Row tile: the primary lever.  Weight HBM traffic = (N/tm)*H*V*2 bytes, so
    # grow tm until the double-buffered resident score block + streamed weight
    # tile fill the VMEM budget.
    if tm is None:
        budget = int(vmem_limit * 0.85)
        fixed = 2 * H * tv * 2 + 2 * tv * 4 + (1 << 20)      # weight + bias + slack
        per_row = 2 * v_pad * out_bytes + 2 * H * 2 + 64     # scores + x + misc
        tm = max(8, (budget - fixed) // per_row)
    tm = int(min(tm, 1024))

    n8 = _round_up(max(N, 1), 8)
    tm = min(tm, n8)
    if n8 >= 16:
        # Keep >= 2 row tiles so the "parallel" axis can split across v7x's two
        # TensorCores (no effect on single-TC v5e/v6e).
        tm = min(tm, _round_up((n8 + 1) // 2, 8))
    tm = max(8, (tm // 8) * 8)

    return _nmt_loss_compute_impl(
        tgt, output, w_hv, bias,
        padding_idx=int(padding_idx), tm=tm, tv=tv,
        vmem_limit=int(vmem_limit), score_dtype=score_dtype)


if __name__ == "__main__":
    # Small shapes consistent with the module: hidden_size=32, vocab_size=256.
    B, T1, H, V = 2, 9, 32, 256
    PAD = 0

    key = jax.random.PRNGKey(0)
    kt, kx, kw, kb = jax.random.split(key, 4)

    tgt = jax.random.randint(kt, (B, T1), 1, V, dtype=jnp.int32)
    tgt = tgt.at[0, 7:].set(PAD).at[1, 5:].set(PAD)            # trailing padding
    output = jax.random.normal(kx, (B, T1 - 1, H), dtype=jnp.float32)

    bound = (1.0 / H) ** 0.5
    weight = jax.random.uniform(kw, (V, H), minval=-bound, maxval=bound,
                                dtype=jnp.float32)              # PyTorch [V, H] layout
    bias = jax.random.uniform(kb, (V,), minval=-bound, maxval=bound,
                              dtype=jnp.float32)

    # Pre-transpose the generator weight once, outside the jitted forward.
    w_hv = jnp.asarray(weight.T)                                # [H, V]

    loss, scores = nmt_loss_compute(tgt, output, w_hv, bias, padding_idx=PAD)
    loss = jax.block_until_ready(loss)
    scores = jax.block_until_ready(scores)

    # Reference (same math as the PyTorch module with label_smoothing=0), using the
    # same bf16-cast matmul inputs the kernel uses.
    N = B * (T1 - 1)
    x_bf = output.reshape(N, H).astype(jnp.bfloat16).astype(jnp.float32)
    w_bf = w_hv.astype(jnp.bfloat16).astype(jnp.float32)
    logits_ref = jnp.dot(x_bf, w_bf, precision=jax.lax.Precision.HIGHEST) + bias
    ref_scores = jax.nn.log_softmax(logits_ref, axis=-1)
    target = tgt[:, 1:].reshape(N)
    nonpad = target != PAD
    ref_ll = jnp.take_along_axis(ref_scores, target[:, None], axis=1)[:, 0]
    ref_loss = -jnp.sum(jnp.where(nonpad, ref_ll, 0.0)) / jnp.sum(nonpad)

    assert scores.shape == (B, T1 - 1, V)
    # Scores are bf16 (per perf review); compare after upcast with bf16-level tol.
    assert jnp.allclose(scores.astype(jnp.float32),
                        ref_scores.reshape(B, T1 - 1, V), atol=6e-2, rtol=0)
    # Loss goes through the f32 scratch path -> tight tolerance.
    assert jnp.allclose(loss, ref_loss, atol=2e-3, rtol=1e-3)

    print("KERNEL_OK")
</pallas_src>

<mosaic_0001>
module attributes {stable_mosaic.version = 11 : i64} {
  func.func @_generator_nll_kernel(%arg0: i32, %arg1: i32, %arg2: memref<8x32xbf16, #tpu.memory_space<vmem>>, %arg3: memref<32x256xbf16, #tpu.memory_space<vmem>>, %arg4: memref<1x256xf32, #tpu.memory_space<vmem>>, %arg5: memref<8x1xi32, #tpu.memory_space<vmem>>, %arg6: memref<8x256xbf16, #tpu.memory_space<vmem>>, %arg7: memref<8x1xf32, #tpu.memory_space<vmem>>, %arg8: memref<8x1xf32, #tpu.memory_space<vmem>>, %arg9: memref<8x1xf32, #tpu.memory_space<vmem>>, %arg10: memref<8x1xf32, #tpu.memory_space<vmem>>) attributes {dimension_semantics = [#tpu.dimension_semantics<parallel>, #tpu.dimension_semantics<arbitrary>], iteration_bounds = array<i64: 2, 1>, scalar_prefetch = 0 : i64, scratch_operands = 3 : i64, tpu.core_type = #tpu.core_type<tc>, window_params = [{transform_indices = @transform_0, window_bounds = array<i64: 8, 32>}, {transform_indices = @transform_1, window_bounds = array<i64: 32, 256>}, {transform_indices = @transform_2, window_bounds = array<i64: 1, 256>}, {transform_indices = @transform_3, window_bounds = array<i64: 8, 1>}, {transform_indices = @transform_4, window_bounds = array<i64: 8, 256>}, {transform_indices = @transform_5, window_bounds = array<i64: 8, 1>}]} {
    %c0_i32 = arith.constant 0 : i32
    %0 = arith.cmpi eq, %arg1, %c0_i32 : i32
    %1 = arith.extui %0 : i1 to i32
    %c0_i32_0 = arith.constant 0 : i32
    %2 = arith.cmpi ne, %1, %c0_i32_0 : i32
    scf.if %2 {
      %cst_28 = arith.constant 0xFF800000 : f32
      %47 = vector.broadcast %cst_28 : f32 to vector<8x1xf32>
      %c0_29 = arith.constant 0 : index
      %c0_30 = arith.constant 0 : index
      %48 = vector.load %arg8[%c0_29, %c0_30] : memref<8x1xf32, #tpu.memory_space<vmem>>, vector<8x1xf32>
      tpu.vector_store %arg8[%c0_29, %c0_30], %47 {strides = array<i32>} : memref<8x1xf32, #tpu.memory_space<vmem>>, vector<8x1xf32>,
      %cst_31 = arith.constant 0.000000e+00 : f32
      %49 = vector.broadcast %cst_31 : f32 to vector<8x1xf32>
      %c0_32 = arith.constant 0 : index
      %c0_33 = arith.constant 0 : index
      %50 = vector.load %arg9[%c0_32, %c0_33] : memref<8x1xf32, #tpu.memory_space<vmem>>, vector<8x1xf32>
      tpu.vector_store %arg9[%c0_32, %c0_33], %49 {strides = array<i32>} : memref<8x1xf32, #tpu.memory_space<vmem>>, vector<8x1xf32>,
      %cst_34 = arith.constant 0.000000e+00 : f32
      %51 = vector.broadcast %cst_34 : f32 to vector<8x1xf32>
      %c0_35 = arith.constant 0 : index
      %c0_36 = arith.constant 0 : index
      %52 = vector.load %arg10[%c0_35, %c0_36] : memref<8x1xf32, #tpu.memory_space<vmem>>, vector<8x1xf32>
      tpu.vector_store %arg10[%c0_35, %c0_36], %51 {strides = array<i32>} : memref<8x1xf32, #tpu.memory_space<vmem>>, vector<8x1xf32>,
    } else {
    }
    %c0 = arith.constant 0 : index
    %c0_1 = arith.constant 0 : index
    %3 = vector.load %arg2[%c0, %c0_1] : memref<8x32xbf16, #tpu.memory_space<vmem>>, vector<8x32xbf16>
    %c0_2 = arith.constant 0 : index
    %c0_3 = arith.constant 0 : index
    %4 = vector.load %arg3[%c0_2, %c0_3] : memref<32x256xbf16, #tpu.memory_space<vmem>>, vector<32x256xbf16>
    %cst = arith.constant dense<0.000000e+00> : vector<8x256xf32>
    %5 = tpu.matmul %3, %4, %cst {dimension_numbers = #tpu.dot_dimension_numbers<[1], [0], [0], [1], [0, 0, 1, 1], [], []>} : vector<8x32xbf16>, vector<32x256xbf16>, vector<8x256xf32> -> vector<8x256xf32>
    %c0_4 = arith.constant 0 : index
    %c0_5 = arith.constant 0 : index
    %6 = vector.load %arg4[%c0_4, %c0_5] : memref<1x256xf32, #tpu.memory_space<vmem>>, vector<1x256xf32>
    %7 = vector.broadcast %6 : vector<1x256xf32> to vector<8x256xf32>
    %8 = arith.addf %5, %7 : vector<8x256xf32>
    %c0_6 = arith.constant 0 : index
    %c0_7 = arith.constant 0 : index
    %9 = vector.load %arg8[%c0_6, %c0_7] : memref<8x1xf32, #tpu.memory_space<vmem>>, vector<8x1xf32>
    %cst_8 = arith.constant dense<0xFF800000> : vector<8xf32>
    %10 = vector.multi_reduction <maximumf>, %8, %cst_8 [1] : vector<8x256xf32> to vector<8xf32>
    %11 = vector.shape_cast %10 : vector<8xf32> to vector<8x1xf32>
    %12 = arith.maximumf %9, %11 : vector<8x1xf32>
    %13 = arith.subf %9, %12 : vector<8x1xf32>
    %14 = math.exp %13 : vector<8x1xf32>
    %c0_9 = arith.constant 0 : index
    %c0_10 = arith.constant 0 : index
    %15 = vector.load %arg9[%c0_9, %c0_10] : memref<8x1xf32, #tpu.memory_space<vmem>>, vector<8x1xf32>
    %16 = arith.mulf %14, %15 : vector<8x1xf32>
    %17 = vector.broadcast %12 : vector<8x1xf32> to vector<8x256xf32>
    %18 = arith.subf %8, %17 : vector<8x256xf32>
    %19 = math.exp %18 : vector<8x256xf32>
    %cst_11 = arith.constant dense<0.000000e+00> : vector<8xf32>
    %20 = vector.multi_reduction <add>, %19, %cst_11 [1] : vector<8x256xf32> to vector<8xf32>
    %21 = vector.shape_cast %20 : vector<8xf32> to vector<8x1xf32>
    %22 = arith.addf %16, %21 : vector<8x1xf32>
    %c0_12 = arith.constant 0 : index
    %c0_13 = arith.constant 0 : index
    %23 = vector.load %arg9[%c0_12, %c0_13] : memref<8x1xf32, #tpu.memory_space<vmem>>, vector<8x1xf32>
    tpu.vector_store %arg9[%c0_12, %c0_13], %22 {strides = array<i32>} : memref<8x1xf32, #tpu.memory_space<vmem>>, vector<8x1xf32>,
    %c0_14 = arith.constant 0 : index
    %c0_15 = arith.constant 0 : index
    %24 = vector.load %arg8[%c0_14, %c0_15] : memref<8x1xf32, #tpu.memory_space<vmem>>, vector<8x1xf32>
    tpu.vector_store %arg8[%c0_14, %c0_15], %12 {strides = array<i32>} : memref<8x1xf32, #tpu.memory_space<vmem>>, vector<8x1xf32>,
    %25 = tpu.iota {dimensions = array<i32: 1>} : vector<8x256xi32>
    %c0_16 = arith.constant 0 : index
    %c0_17 = arith.constant 0 : index
    %26 = vector.load %arg5[%c0_16, %c0_17] : memref<8x1xi32, #tpu.memory_space<vmem>>, vector<8x1xi32>
    %c256_i32 = arith.constant 256 : i32
    %27 = arith.muli %arg1, %c256_i32 : i32
    %28 = vector.broadcast %27 : i32 to vector<8x1xi32>
    %29 = arith.subi %26, %28 : vector<8x1xi32>
    %30 = vector.broadcast %29 : vector<8x1xi32> to vector<8x256xi32>
    %31 = arith.cmpi eq, %25, %30 : vector<8x256xi32>
    %c0_18 = arith.constant 0 : index
    %c0_19 = arith.constant 0 : index
    %32 = vector.load %arg10[%c0_18, %c0_19] : memref<8x1xf32, #tpu.memory_space<vmem>>, vector<8x1xf32>
    %cst_20 = arith.constant 0.000000e+00 : f32
    %33 = vector.broadcast %cst_20 : f32 to vector<8x256xf32>
    %34 = arith.select %31, %8, %33 : vector<8x256xi1>, vector<8x256xf32>
    %cst_21 = arith.constant dense<0.000000e+00> : vector<8xf32>
    %35 = vector.multi_reduction <add>, %34, %cst_21 [1] : vector<8x256xf32> to vector<8xf32>
    %36 = vector.shape_cast %35 : vector<8xf32> to vector<8x1xf32>
    %37 = arith.addf %32, %36 : vector<8x1xf32>
    %c0_22 = arith.constant 0 : index
    %c0_23 = arith.constant 0 : index
    %38 = vector.load %arg10[%c0_22, %c0_23] : memref<8x1xf32, #tpu.memory_space<vmem>>, vector<8x1xf32>
    tpu.vector_store %arg10[%c0_22, %c0_23], %37 {strides = array<i32>} : memref<8x1xf32, #tpu.memory_space<vmem>>, vector<8x1xf32>,
    %c256_i32_24 = arith.constant 256 : i32
    %39 = arith.muli %arg1, %c256_i32_24 : i32
    %40 = tpu.assume_multiple %39, 256 : i32
    %41 = arith.truncf %8 : vector<8x256xf32> to vector<8x256xbf16>
    %c0_25 = arith.constant 0 : index
    %42 = arith.index_cast %40 : i32 to index
    %43 = vector.load %arg6[%c0_25, %42] : memref<8x256xbf16, #tpu.memory_space<vmem>>, vector<8x256xbf16>
    tpu.vector_store %arg6[%c0_25, %42], %41 {strides = array<i32>} : memref<8x256xbf16, #tpu.memory_space<vmem>>, vector<8x256xbf16>,
    %c0_i32_26 = arith.constant 0 : i32
    %44 = arith.cmpi eq, %arg1, %c0_i32_26 : i32
    %45 = arith.extui %44 : i1 to i32
    %c0_i32_27 = arith.constant 0 : i32
    %46 = arith.cmpi ne, %45, %c0_i32_27 : i32
    scf.if %46 {
      %c0_28 = arith.constant 0 : index
      %c0_29 = arith.constant 0 : index
      %47 = vector.load %arg8[%c0_28, %c0_29] : memref<8x1xf32, #tpu.memory_space<vmem>>, vector<8x1xf32>
      %c0_30 = arith.constant 0 : index
      %c0_31 = arith.constant 0 : index
      %48 = vector.load %arg9[%c0_30, %c0_31] : memref<8x1xf32, #tpu.memory_space<vmem>>, vector<8x1xf32>
      %49 = math.log %48 : vector<8x1xf32>
      %50 = arith.addf %47, %49 : vector<8x1xf32>
      %c0_32 = arith.constant 0 : index
      %c0_33 = arith.constant 0 : index
      %51 = vector.load %arg6[%c0_32, %c0_33] : memref<8x256xbf16, #tpu.memory_space<vmem>>, vector<8x256xbf16>
      %52 = arith.extf %51 : vector<8x256xbf16> to vector<8x256xf32>
      %53 = vector.broadcast %50 : vector<8x1xf32> to vector<8x256xf32>
      %54 = arith.subf %52, %53 : vector<8x256xf32>
      %55 = arith.truncf %54 : vector<8x256xf32> to vector<8x256xbf16>
      %c0_34 = arith.constant 0 : index
      %c0_35 = arith.constant 0 : index
      %56 = vector.load %arg6[%c0_34, %c0_35] : memref<8x256xbf16, #tpu.memory_space<vmem>>, vector<8x256xbf16>
      tpu.vector_store %arg6[%c0_34, %c0_35], %55 {strides = array<i32>} : memref<8x256xbf16, #tpu.memory_space<vmem>>, vector<8x256xbf16>,
      %c0_36 = arith.constant 0 : index
      %c0_37 = arith.constant 0 : index
      %57 = vector.load %arg10[%c0_36, %c0_37] : memref<8x1xf32, #tpu.memory_space<vmem>>, vector<8x1xf32>
      %58 = arith.subf %57, %50 : vector<8x1xf32>
      %c0_38 = arith.constant 0 : index
      %c0_39 = arith.constant 0 : index
      %59 = vector.load %arg7[%c0_38, %c0_39] : memref<8x1xf32, #tpu.memory_space<vmem>>, vector<8x1xf32>
      tpu.vector_store %arg7[%c0_38, %c0_39], %58 {strides = array<i32>} : memref<8x1xf32, #tpu.memory_space<vmem>>, vector<8x1xf32>,
    } else {
    }
    return
  }
  func.func @transform_0(%arg0: i32, %arg1: i32) -> (i32, i32) {
    %c0_i32 = arith.constant 0 : i32
    %c0_i32_0 = arith.constant 0 : i32
    return %arg0, %c0_i32 : i32, i32
  }
  func.func @transform_1(%arg0: i32, %arg1: i32) -> (i32, i32) {
    %c0_i32 = arith.constant 0 : i32
    %c0_i32_0 = arith.constant 0 : i32
    return %c0_i32, %arg1 : i32, i32
  }
  func.func @transform_2(%arg0: i32, %arg1: i32) -> (i32, i32) {
    %c0_i32 = arith.constant 0 : i32
    %c0_i32_0 = arith.constant 0 : i32
    return %c0_i32, %arg1 : i32, i32
  }
  func.func @transform_3(%arg0: i32, %arg1: i32) -> (i32, i32) {
    %c0_i32 = arith.constant 0 : i32
    %c0_i32_0 = arith.constant 0 : i32
    return %arg0, %c0_i32 : i32, i32
  }
  func.func @transform_4(%arg0: i32, %arg1: i32) -> (i32, i32) {
    %c0_i32 = arith.constant 0 : i32
    %c0_i32_0 = arith.constant 0 : i32
    return %arg0, %c0_i32 : i32, i32
  }
  func.func @transform_5(%arg0: i32, %arg1: i32) -> (i32, i32) {
    %c0_i32 = arith.constant 0 : i32
    %c0_i32_0 = arith.constant 0 : i32
    return %arg0, %c0_i32 : i32, i32
  }
}

</mosaic_0001>

<bundles_post_ra>
// kernel: _nmt_loss_compute_impl.1
= control target key start
LH: loop header
LB: loop body
LE: loop exit
PB: predicated region body
PF: predicated region fallthrough
CT: control target
= control target key end

     0   :  { %11 = vsyncpa [#allocation6], 0  ;;  %s999_s0 = inlined_call_operand.vmem [shape: bf16[16,32], index: 0, kind: input, shape index: {}]   ;;  %s1000_s1 = inlined_call_operand.vmem [shape: bf16[32,256], index: 1, kind: input, shape index: {}]   ;;  %s1001_s2 = inlined_call_operand.vmem [shape: f32[1,256], index: 2, kind: input, shape index: {}]   ;;  %s1002_s3 = inlined_call_operand.vmem [shape: s32[16,1], index: 3, kind: input, shape index: {}]   ;;  %s1003_s4 = inlined_call_operand.hbm [shape: bf16[16,256], index: 4, kind: output, shape index: {0}]   ;;  %s1004_s5 = inlined_call_operand.vmem [shape: f32[16,1], index: 5, kind: output, shape index: {1}]  }
   0x1   :  { %13 = vsyncpa [#allocation6 + $0x1], 0  ;;  %s851_s18 = smov 0   ;;  %s853_s19 = smov 0  }
   0x2   :  { %s855_s20 = smov 0   ;;  %s857_s21 = smov 0  }
   0x3   :  { %s859_s22 = smov 0   ;;  %s861_s23 = smov 0  }
   0x4 LB: > { %s637_s24 = sadd.s32 4294967295, %s815_s23   ;;  %s638_s25 = sadd.s32 4294967294, %s815_s23   ;;  %s815_s23 = sphi %s861_s23, %s19_s23   ;;  %s811_s22 = sphi %s859_s22, %s1011_s22   ;;  %s807_s21 = sphi %s857_s21, %s1010_s21   ;;  %s803_s20 = sphi %s855_s20, %s1009_s20   ;;  %s799_s19 = sphi %s853_s19, %s1008_s19   ;;  %s795_s18 = sphi %s851_s18, %s1007_s18  }
   0x5   : > { %s31_s26 = sadd.s32 1, %s811_s22  ;;  %s142_s27 = sadd.s32 1, %s803_s20 }
   0x6   : > { %p33_p0 = scmp.ge.s32.totalorder %s31_s26, 2  ;;  %p152_p1 = scmp.ne.s32.totalorder %s803_s20, %s799_s19 }
   0x7   : > { %p153_p2 = scmp.eq.s32.totalorder %s637_s24, 1  ;;  %p158_p3 = scmp.ne.s32.totalorder %s799_s19, %s795_s18 }
   0x8   : > { %s1013_s26 = smov (%p33_p0, %s31_s26), 0  ;;  %p159_p5 = scmp.eq.s32.totalorder %s638_s25, 1 }
   0x9   : > { %p891_p4 = por %p153_p2, %p152_p1  ;;  %s139_s29 = ssub.s32 %s811_s22, %s1013_s26 }
   0xa   : > { %p643_p6 = scmp.ge.s32.totalorder %s815_s23, 1  ;;  %p140_p7 = scmp.eq.s32.totalorder %s139_s29, 0 }
   0xb   : > { %p898_p8 = por %p159_p5, %p158_p3  ;;  %p234_p9 = scmp.lt.s32.totalorder %s815_s23, 3 }
   0xc   : > { %s904_s6 = scalar_select %p140_p7, %s803_s20, %s142_s27  }
   0xd   : > { %p235_p10 = pnand %p643_p6, %p234_p9 }
   0xe   : > { %v723_v0 = vld [vmem:[%s1000_s1 + $0x4] ss:$8 sps:$4 sm:$0xff] (!%p235_p10)   ;;  %p278_p11 = scmp.lt.s32.totalorder (!%p235_p10), %s807_s21, 1  ;;  %v725_v1 = vld [vmem:[%s1000_s1] ss:$8 sps:$4 sm:$0xff] (!%p235_p10)   ;;  %v817_v2 = vmov (!%p235_p10), 0   ;;  %v317_v7 = vlaneseq (!%p235_p10) }
   0xf   : > { %238 = sbr.rel (%p235_p10) target bundleno = 850 (0x352), region = 36  ;;  %383 = vmatprep.mubr.bf16.mxu0 (!%p235_p10), %v817_v2  ;;  %721 = vset.pattern.permute.xlu0 (!%p235_p10), %v817_v2  ;;  %v726_v3 = vld [vmem:[%s1000_s1 + $0x14] ss:$8 sps:$4 sm:$0xff] (!%p235_p10)   ;;  %v728_v4 = vld [vmem:[%s1000_s1 + $0x10] ss:$8 sps:$4 sm:$0xff] (!%p235_p10)   ;;  %vm347_vm0 = vcmask (!%p235_p10), 261120  }
  0x10   : > { %351 = vmatprep.subr.bf16.mxu0 (!%p235_p10), %v723_v0  ;;  %722 = vset.pattern.permute.xlu1 (!%p235_p10), %v817_v2  ;;  %vm306_vm1 = vcmask (!%p235_p10), 7168   ;;  %v818_v6 = vmov (!%p235_p10), -inf   ;;  %v318_v8 = vshrl.u32 (!%p235_p10), %v317_v7, 7  ;;  %v315_v10 = vld [vmem:[%s1001_s2] sm:$0x3] (!%p235_p10)  ;;  %v819_v21 = vmov (!%p235_p10), 0.0  }
  0x11   : > { %352 = vmatpush1.bf16.msra.mxu0 (!%p235_p10), %v725_v1  ;;  %307 = vst.msk [vmem:[#allocation2] sm:$0xff] (!%p235_p10), %vm306_vm1, %v818_v6  ;;  %308 = vst.msk [vmem:[#allocation3] sm:$0xff] (!%p235_p10), %vm306_vm1, %v819_v21  ;;  %v421_v38 = vand.u32 (!%p235_p10), 127, %v317_v7  ;;  %s269_s11 = sand.u32 (!%p235_p10), 1, %s799_s19   ;;  %s662_s14 = sshll.u32 (!%p235_p10), %s807_s21, 7 }
  0x12   : > { %353 = vmatprep.subr.bf16.mxu0 (!%p235_p10), %v726_v3  ;;  %v319_v9 = vsub.s32 (!%p235_p10), 0, %v318_v8  ;;  %v323_v11 = vsub.s32 (!%p235_p10), 1, %v318_v8  ;;  %309 = vst.msk [vmem:[#allocation4] sm:$0xff] (!%p235_p10), %vm306_vm1, %v819_v21  ;;  %s644_s12 = sshll.u32 (!%p235_p10), %s269_s11, 3  ;;  %s484_s27 = scalar_lea.sflag (!%p235_p10), [#allocation6], %s269_s11 }
  0x13   : > { %v422_v42 = vadd.s32 (!%p235_p10), 128, %v421_v38  ;;  %s271_s15 = scalar_lea.vmem (!%p235_p10), [#allocation5], %s644_s12 }
  0x14   : > { %v320_v12 = vrot.slane (!%p235_p10), %v315_v10, %v319_v9  ;;  %v324_v13 = vrot.slane (!%p235_p10), %v315_v10, %v323_v11 }
  0x15   : > { %354 = vmatpush1.bf16.msra.mxu0 (!%p235_p10), %v728_v4 }
  0x16   : > { %s917_s13 = scalar_select %p278_p11, %s807_s21, 1 }
  0x17   : > { %s820_s21 = smov [#allocation5]  }
  0x18   : > { %s645_s16 = sshll.u32 %s917_s13, 2  ;;  %v392_v22 = vld [vmem:[#allocation2] sm:$0xff]  ;;  %s646_s7 = sshll.u32 %s917_s13, 3  ;;  %v400_v37 = vld [vmem:[#allocation3] sm:$0xff] }
  0x19   : > { %s281_s25 = scalar_lea.vmem %s999_s0, %s645_s16  ;;  %s296_s10 = scalar_lea.vmem %s1002_s3, %s646_s7  ;;  %v432_v53 = vld [vmem:[#allocation4] sm:$0xff] }
  0x1a   : > { %v310_v5 = vld [vmem:[%s281_s25] sm:$0xf]  ;;  %s502_s16 = sshll.u32 %s271_s15, 4  ;;  %s946_s25 = scalar_lea.hbm %s1003_s4, %s662_s14  ;;  %s948_s16 = int_to_ptr.vmem [resolvable:$true] %s502_s16 }
  0x1b   : > { %652 = vmatmul.mubr.msk.bf16.vlgmr.msra.gmra.mrb[0].mxu0 %vm347_vm0, %v310_v5  ;;  %v423_v34 = vld [vmem:[%s296_s10] sm:$0xff]  ;;  %s737_s29 = scalar_lea.vmem %s948_s16, 128  ;;  %s741_s8 = sshll.u32 %s820_s21, 4  ;;  %s742_s8 = int_to_ptr.vmem [resolvable:$false] %s741_s8 }
  0x1c   : > { %p738_p12 = scmp.ne.s32.totalorder %s948_s16, %s737_s29  ;;  %s743_s9 = scalar_lea.vmem %s742_s8, 256 }
  0x1d   : > { %p744_p1 = scmp.lt.s32.totalorder %s948_s16, %s742_s8  ;;  %p745_p2 = scmp.lt.s32.totalorder %s743_s9, %s737_s29 }
  0x1e   : > { %p739_p13 = pnand %p738_p12, %p891_p4 }
  0x1f   : > { %p746_p3 = por %p745_p2, %p744_p1 }
  0x20   : > { %p740_p0 = pneg %p739_p13 }
  0x22   : > { %p747_p5 = pnand %p746_p3, %p740_p0 }
  0xee   : > { %v385_v14 = vpop.f32.mrb[0].mxu0 }
  0xef   : > { %v386_v15 = vadd.f32 %v385_v14, %v320_v12  ;;  %v387_v16 = vpop.f32.mrb[1].mxu0 }
  0xf0   : > { %v388_v17 = vadd.f32 %v387_v16, %v324_v13  ;;  %v389_v18 = vpop.f32.mrb[2].mxu0 }
  0xf1   : > { %v390_v19 = vpop.f32.mrb[3].mxu0 }
  0xf2   : > { %v393_v20 = vmax.f32 %v386_v15, %v388_v17  ;;  %v660_v52 = vpack.c.bf16 %v388_v17, %v386_v15 }
  0xf4   : > { %394 = vmax.xlane.f32.xlu0 %v393_v20  ;;  %v462_v56 = vunpack.c.l.bf16 %v660_v52  ;;  %v463_v57 = vunpack.c.h.bf16 %v660_v52 }
 0x181   : > { %v395_v23 = vpop.xlane.xlu0 %394 }
 0x182   : > { %v396_v24 = vmax.f32 %v392_v22, %v395_v23 }
 0x184   : > { %v397_v25 = vsub.f32 %v392_v22, %v396_v24  ;;  %419 = vst.msk [vmem:[#allocation2] sm:$0xff] %vm306_vm1, %v396_v24  ;;  %404 = vperm.xlu0 %721, %v396_v24  }
 0x186   : > { %v398_v35 = vmul.f32 1.442695, %v397_v25 }
 0x18b   : > { %v456_v50 = vld [vmem:[#allocation2] sm:$0xff] }
 0x203   : > { %v405_v26 = vpop.permute.xlu0 %404 }
 0x204   : > { %v407_v27 = vsub.f32 %v386_v15, %v405_v26  ;;  %v408_v28 = vsub.f32 %v388_v17, %v405_v26 }
 0x206   : > { %v409_v29 = vmul.f32 1.442695, %v407_v27  ;;  %v411_v30 = vmul.f32 1.442695, %v408_v28 }
 0x208   : > { %729 = vpow2.f32 %v409_v29 }
 0x209   : > { %731 = vpow2.f32 %v411_v30 }
 0x20a   : > { %733 = vpow2.f32 %v398_v35 }
 0x212   : > { %v730_v31 = vpop.eup %729 }
 0x213   : > { %v732_v32 = vpop.eup %731 }
 0x214   : > { %v413_v33 = vadd.f32 %v732_v32, %v730_v31  ;;  %v734_v36 = vpop.eup %733 }
 0x215   : > { %v401_v39 = vmul.f32 %v734_v36, %v400_v37 }
 0x216   : > { %414 = vadd.xlane.f32.xlu1 %v413_v33 }
 0x227   : > { %428 = vperm.xlu1 %722, %v423_v34  }
 0x2a3   : > { %v415_v40 = vpop.xlane.xlu1 %414 }
 0x2a4   : > { %v416_v41 = vadd.f32 %v415_v40, %v401_v39 }
 0x2a6   : > { %418 = vst.msk [vmem:[#allocation3] sm:$0xff] %vm306_vm1, %v416_v41 }
 0x2a7   : > { %v429_v43 = vpop.permute.xlu1 %428 }
 0x2a8   : > { %vm430_vm2 = vcmp.eq.s32.totalorder %v421_v38, %v429_v43  ;;  %vm431_vm3 = vcmp.eq.s32.totalorder %v422_v42, %v429_v43 }
 0x2a9   : > { %v433_v44 = vsel %vm430_vm2, %v386_v15, 0.0  ;;  %v434_v45 = vsel %vm431_vm3, %v388_v17, 0.0 }
 0x2aa   : > { %v435_v46 = vadd.f32 %v434_v45, %v433_v44 }
 0x2ac   : > { %436 = vadd.xlane.f32.xlu1 %v435_v46 }
 0x2ad   : > { %v457_v47 = vld [vmem:[#allocation3] sm:$0xff] }
 0x2ae   : > { %735 = vlog2.f32 %v457_v47 }
 0x2b8   : > { %v736_v48 = vpop.eup %735 }
 0x2b9   : > { %v459_v49 = vmul.f32 0.6931472, %v736_v48 }
 0x2bb   : > { %v460_v51 = vadd.f32 %v459_v49, %v456_v50 }
 0x2bd   : > { %466 = vperm.xlu0 %721, %v460_v51  }
 0x339   : > { %v437_v54 = vpop.xlane.xlu1 %436 }
 0x33a   : > { %v438_v55 = vadd.f32 %v437_v54, %v432_v53 }
 0x33c   : > { %439 = vst.msk [vmem:[#allocation4] sm:$0xff] %vm306_vm1, %v438_v55  ;;  %v467_v58 = vpop.permute.xlu0 %466 }
 0x33d   : > { %v469_v59 = vsub.f32 %v462_v56, %v467_v58  ;;  %v470_v60 = vsub.f32 %v463_v57, %v467_v58 }
 0x33f   : > { %v661_v61 = vpack.c.bf16 %v470_v60, %v469_v59 }
 0x341   : > { %479 = vst [vmem:[%s271_s15] sm:$0xff] %v661_v61 }
 0x342   : > { %750 = shalt.err (!%p747_p5)
}
 0x343   : > { %s751_s10 = scalar_lea.hbm %s946_s25, 128  ;;  %s755_s14 = scalar_lea.hbm %s1003_s4, 256 }
 0x344   : > { %p752_p6 = scmp.ne.s32.totalorder %s946_s25, %s751_s10  ;;  %p756_p10 = scmp.lt.u32.totalorder %s946_s25, %s1003_s4 }
 0x345   : > { %p757_p11 = scmp.lt.u32.totalorder %s755_s14, %s751_s10  ;;  %p759_p13 = scmp.lt.u32.totalorder %s751_s10, %s946_s25 }
 0x346   : > { %p753_p7 = pnand %p752_p6, %p891_p4 }
 0x347   : > { %p758_p12 = por %p757_p11, %p756_p10 }
 0x348   : > { %p754_p9 = pneg %p753_p7 }
 0x349   : > { %p760_p0 = por %p759_p13, %p758_p12 }
 0x34b   : > { %p761_p1 = pnand %p760_p0, %p754_p9 }
 0x34d   : > { %764 = shalt.err (!%p761_p1)
}
 0x34e   : > { %663 = dma.vmem_to_hbm [thread:$0]  (%p891_p4), %s948_s16, 128, %s946_s25, %s484_s27   ;;  %v480_v62 = vld [vmem:[#allocation4] sm:$0xff] }
 0x34f   : > { %s300_s21 = scalar_lea.vmem %s1004_s5, %s646_s7  ;;  %v481_v63 = vsub.f32 %v480_v62, %v460_v51 }
 0x351   : > { %482 = vst.msk [vmem:[%s300_s21] sm:$0xff] %vm306_vm1, %v481_v63 }
 0x352 PF: > { %p669_p2 = scmp.ge.s32.totalorder %s815_s23, 2  ;;  %s517_s8 = sand.u32 1, %s795_s18  }
 0x353   : > { %s518_s28 = scalar_lea.sflag [#allocation6], %s517_s8 }
 0x354   : > { %p666_p3 = pnand %p669_p2, %p898_p8 }
 0x356   : > { %790 = dma.done.wait (!%p666_p3), %s518_s28, 128  }
 0x357   : > { %792 = vsyncadd (!%p666_p3), %s518_s28, 4294967168  ;;  %s19_s23 = sadd.s32 1, %s815_s23   ;;  %s1007_s18 = smov %s799_s19 }
 0x358   : > { %p16_p4 = scmp.ge.s32.totalorder %s19_s23, 4   ;;  %s1008_s19 = smov %s803_s20 }
 0x359   : > { %s1009_s20 = smov %s904_s6  ;;  %s1010_s21 = smov %s811_s22 }
 0x35a   : > { %s1011_s22 = smov %s1013_s26  ;;  %18 = sbr.rel (!%p16_p4) target bundleno = 4 (0x4), region = 101 }
 0x361   :  { %530 = vsyncpa [#allocation6], 1 }
 0x362   :  { %532 = vsyncpa [#allocation6 + $0x1], 1 }

</bundles_post_ra>
